<compile_context>
chip_gen: v5e
topology: v5e:2x2
jax: 0.10.0
libtpu: 0.0.40
codegen_flags: <defaults>
</compile_context>

<pallas_src>
import jax
import jax.numpy as jnp
from jax.experimental import pallas as pl
from jax.experimental.pallas import tpu as pltpu


def _bias_sign_kernel(x_ref, b_ref, o_ref):
    # x_ref: (Rt, Lt) tile in the input dtype; b_ref: (Rt, 1) or (1, Lt) bias
    # tile in the compute/output dtype (broadcasts along the other axis).
    s = x_ref[...] + b_ref[...]
    one = jnp.ones((), o_ref.dtype)
    zero = jnp.zeros((), o_ref.dtype)
    o_ref[...] = jnp.where(s > 0, one, jnp.where(s < 0, -one, zero))


def _largest_aligned_divisor(dim: int, align: int, cap: int) -> int:
    """Largest divisor of `dim` that is a multiple of `align` and <= cap.

    `dim` must already be a multiple of `align`; `align` is always legal.
    """
    n_units = dim // align
    max_units = max(1, min(n_units, cap // align))
    for u in range(max_units, 0, -1):
        if n_units % u == 0:
            return u * align
    return align


def _select_tiles(R: int, L: int, in_itemsize: int, out_itemsize: int):
    """Pick (Rt, Lt): full-row lane tiles preferred, sized by a byte budget."""
    # ~8 MiB combined (input + output) per tile -> ~16 MiB double-buffered.
    tile_pair_bytes = 8 << 20
    tile_elems = max(8 * 128, tile_pair_bytes // (in_itemsize + out_itemsize))

    if L * 8 <= tile_elems:
        # Full-row lane tile; grow the row tile to fill the byte budget.
        Lt = L
        max_rows = max(8, (tile_elems // L) // 8 * 8)
        Rt = _largest_aligned_divisor(R, 8, max_rows)
    else:
        # Row is too long even for an 8-row tile: split lanes instead.
        max_lanes = max(128, (tile_elems // 8) // 128 * 128)
        Lt = _largest_aligned_divisor(L, 128, max_lanes)
        Rt = 8
    return Rt, Lt


def input_bias_binarizer(x: jax.Array, bias: jax.Array | None) -> jax.Array:
    """x: (N, C, H, W); bias: (C,) float parameter (the (1,C,1,1) param, squeezed).

    bias=None corresponds to the add_bias=False path (plain sign)."""
    N, C, H, W = x.shape
    if bias is None:
        bias = jnp.zeros((C,), dtype=x.dtype)

    out_dtype = jnp.promote_types(x.dtype, bias.dtype)
    L_nchw = H * W

    # --- choose lane-dense flatten orientation ------------------------------
    if L_nchw % 128 == 0 or C % 128 != 0:
        # Default NCHW flatten: rows = N*C, lanes = H*W; bias is a row column.
        nchw = True
        R, L = N * C, L_nchw
        x2d = x.reshape(R, L)
        bias2d = jnp.broadcast_to(
            bias.astype(out_dtype).reshape(1, C), (N, C)
        ).reshape(R, 1)
    else:
        # NHWC flatten: channels (128-multiple) on the lane axis.
        nchw = False
        R, L = N * H * W, C
        x2d = x.transpose(0, 2, 3, 1).reshape(R, L)
        bias2d = bias.astype(out_dtype).reshape(1, C)

    # --- pad to (8, 128) multiples so no full-extent fallback is needed ------
    Rp = -(-R // 8) * 8
    Lp = -(-L // 128) * 128
    if (Rp, Lp) != (R, L):
        x2d = jnp.pad(x2d, ((0, Rp - R), (0, Lp - L)))
        if nchw:
            bias2d = jnp.pad(bias2d, ((0, Rp - R), (0, 0)))
        else:
            bias2d = jnp.pad(bias2d, ((0, 0), (0, Lp - L)))

    # --- byte-based tile selection ------------------------------------------
    in_itemsize = jnp.dtype(x.dtype).itemsize
    out_itemsize = jnp.dtype(out_dtype).itemsize
    Rt, Lt = _select_tiles(Rp, Lp, in_itemsize, out_itemsize)
    grid = (Rp // Rt, Lp // Lt)

    if nchw:
        bias_spec = pl.BlockSpec((Rt, 1), lambda i, j: (i, 0))
    else:
        bias_spec = pl.BlockSpec((1, Lt), lambda i, j: (0, j))

    out2d = pl.pallas_call(
        _bias_sign_kernel,
        out_shape=jax.ShapeDtypeStruct((Rp, Lp), out_dtype),
        grid=grid,
        in_specs=[
            pl.BlockSpec((Rt, Lt), lambda i, j: (i, j)),
            bias_spec,
        ],
        out_specs=pl.BlockSpec((Rt, Lt), lambda i, j: (i, j)),
        compiler_params=pltpu.CompilerParams(
            dimension_semantics=("parallel", "parallel"),
            vmem_limit_bytes=32 << 20,
        ),
    )(x2d, bias2d)

    out2d = out2d[:R, :L]
    if nchw:
        return out2d.reshape(N, C, H, W)
    return out2d.reshape(N, H, W, C).transpose(0, 3, 1, 2)


if __name__ == "__main__":
    # Small shapes consistent with a conv module: batch=2, in_channels=4, spatial=16.
    N, C, H, W = 2, 4, 16, 16
    key = jax.random.PRNGKey(0)
    x = jax.random.normal(key, (N, C, H, W), dtype=jnp.float32)

    # Parameter mirrors nn.Parameter(torch.zeros(1, C, 1, 1)); add a small
    # deterministic nonzero component so the bias path is actually exercised.
    bias = jnp.zeros((C,), dtype=jnp.float32) + 0.1 * jnp.arange(C, dtype=jnp.float32)

    out = input_bias_binarizer(x, bias)
    out = jax.block_until_ready(out)

    # Reference check in plain JAX (same math as the PyTorch forward).
    ref = jnp.sign(x + bias.reshape(1, C, 1, 1))
    assert out.shape == (N, C, H, W)
    assert out.dtype == jnp.promote_types(x.dtype, bias.dtype)
    assert bool(jnp.all(out == ref))

    print("KERNEL_OK")
</pallas_src>

<mosaic_0001>
module attributes {stable_mosaic.version = 11 : i64} {
  func.func @_bias_sign_kernel(%arg0: i32, %arg1: i32, %arg2: memref<8x256xf32, #tpu.memory_space<vmem>>, %arg3: memref<8x1xf32, #tpu.memory_space<vmem>>, %arg4: memref<8x256xf32, #tpu.memory_space<vmem>>) attributes {dimension_semantics = [#tpu.dimension_semantics<parallel>, #tpu.dimension_semantics<parallel>], iteration_bounds = array<i64: 1, 1>, scalar_prefetch = 0 : i64, scratch_operands = 0 : i64, tpu.core_type = #tpu.core_type<tc>, window_params = [{transform_indices = @transform_0, window_bounds = array<i64: 8, 256>}, {transform_indices = @transform_1, window_bounds = array<i64: 8, 1>}, {transform_indices = @transform_2, window_bounds = array<i64: 8, 256>}]} {
    %c0 = arith.constant 0 : index
    %c0_0 = arith.constant 0 : index
    %0 = vector.load %arg2[%c0, %c0_0] : memref<8x256xf32, #tpu.memory_space<vmem>>, vector<8x256xf32>
    %c0_1 = arith.constant 0 : index
    %c0_2 = arith.constant 0 : index
    %1 = vector.load %arg3[%c0_1, %c0_2] : memref<8x1xf32, #tpu.memory_space<vmem>>, vector<8x1xf32>
    %2 = vector.broadcast %1 : vector<8x1xf32> to vector<8x256xf32>
    %3 = arith.addf %0, %2 : vector<8x256xf32>
    %cst = arith.constant 0.000000e+00 : f32
    %4 = vector.broadcast %cst : f32 to vector<8x256xf32>
    %5 = arith.cmpf ogt, %3, %4 : vector<8x256xf32>
    %cst_3 = arith.constant 0.000000e+00 : f32
    %6 = vector.broadcast %cst_3 : f32 to vector<8x256xf32>
    %7 = arith.cmpf olt, %3, %6 : vector<8x256xf32>
    %cst_4 = arith.constant 0.000000e+00 : f32
    %cst_5 = arith.constant 1.000000e+00 : f32
    %8 = arith.subf %cst_4, %cst_5 : f32
    %cst_6 = arith.constant 0.000000e+00 : f32
    %9 = vector.broadcast %8 : f32 to vector<8x256xf32>
    %10 = vector.broadcast %cst_6 : f32 to vector<8x256xf32>
    %11 = arith.select %7, %9, %10 : vector<8x256xi1>, vector<8x256xf32>
    %cst_7 = arith.constant 1.000000e+00 : f32
    %12 = vector.broadcast %cst_7 : f32 to vector<8x256xf32>
    %13 = arith.select %5, %12, %11 : vector<8x256xi1>, vector<8x256xf32>
    %c0_8 = arith.constant 0 : index
    %c0_9 = arith.constant 0 : index
    %14 = vector.load %arg4[%c0_8, %c0_9] : memref<8x256xf32, #tpu.memory_space<vmem>>, vector<8x256xf32>
    tpu.vector_store %arg4[%c0_8, %c0_9], %13 {strides = array<i32>} : memref<8x256xf32, #tpu.memory_space<vmem>>, vector<8x256xf32>,
    return
  }
  func.func @transform_0(%arg0: i32, %arg1: i32) -> (i32, i32) {
    %c0_i32 = arith.constant 0 : i32
    return %arg0, %arg1 : i32, i32
  }
  func.func @transform_1(%arg0: i32, %arg1: i32) -> (i32, i32) {
    %c0_i32 = arith.constant 0 : i32
    %c0_i32_0 = arith.constant 0 : i32
    return %arg0, %c0_i32 : i32, i32
  }
  func.func @transform_2(%arg0: i32, %arg1: i32) -> (i32, i32) {
    %c0_i32 = arith.constant 0 : i32
    return %arg0, %arg1 : i32, i32
  }
}

</mosaic_0001>

<bundles_post_ra>
// kernel: tpu_custom_call.1
= control target key start
LH: loop header
LB: loop body
LE: loop exit
PB: predicated region body
PF: predicated region fallthrough
CT: control target
= control target key end

     0   :  { %7 = vsyncpa [#allocation3], 0  ;;  %s148_s0 = inlined_call_operand.hbm [shape: f32[8,256], index: 0, kind: input, shape index: {}]   ;;  %s149_s1 = inlined_call_operand.vmem [shape: f32[8,1], index: 1, kind: input, shape index: {}]   ;;  %s150_s2 = inlined_call_operand.hbm [shape: f32[8,256], index: 2, kind: output, shape index: {}]  }
   0x1   :  { %8 = vsyncpa [#allocation4], 0  ;;  %s14_s11 = sshll.u32 %s148_s0, 4  ;;  %s120_s12 = smov [#allocation2]   ;;  %s15_s11 = int_to_ptr.hbm [resolvable:$true] %s14_s11 }
   0x2   :  { %s16_s13 = sshll.u32 %s120_s12, 4  ;;  %s17_s13 = int_to_ptr.vmem [resolvable:$true] %s16_s13 }
   0x3   :  { %19 = dma.hbm_to_vmem [thread:$0]  %s15_s11, 256, %s17_s13, [#allocation3]  }
   0x4   :  { %116 = dma.done.wait [#allocation3], 256  }
   0x5   :  { %117 = vsyncadd [#allocation3], 4294967040  ;;  %v121_v0 = vmov 0   ;;  %v28_v1 = vld [vmem:[%s149_s1] sm:$0xff]  ;;  %v27_v3 = vld [vmem:[#allocation2 + $0x8] sm:$0xff]  ;;  %s122_s0 = smov [#allocation5]  }
   0x6   :  { %67 = vset.pattern.permute.xlu0 %v121_v0  ;;  %v26_v2 = vld [vmem:[#allocation2] sm:$0xff]  ;;  %s51_s16 = sshll.u32 %s122_s0, 4  ;;  %s53_s19 = sshll.u32 %s150_s2, 4  ;;  %v123_v7 = vmov 0.0   ;;  %s52_s16 = int_to_ptr.vmem [resolvable:$true] %s51_s16  ;;  %s54_s19 = int_to_ptr.hbm [resolvable:$true] %s53_s19 }
   0x7   :  { %31 = vperm.xlu0 %67, %v28_v1  }
  0x79   :  { %v32_v4 = vpop.permute.xlu0 %31 }
  0x7a   :  { %v34_v5 = vadd.f32 %v32_v4, %v26_v2  ;;  %v35_v6 = vadd.f32 %v32_v4, %v27_v3 }
  0x7c   :  { %vm36_vm0 = vcmp.gt.f32.partialorder %v34_v5, 0.0  ;;  %vm37_vm1 = vcmp.gt.f32.partialorder %v35_v6, 0.0  ;;  %vm38_vm2 = vcmp.lt.f32.partialorder %v34_v5, 0.0  ;;  %vm39_vm3 = vcmp.lt.f32.partialorder %v35_v6, 0.0 }
  0x7d   :  { %v40_v8 = vsel %vm38_vm2, -1.0, %v123_v7  ;;  %v41_v9 = vsel %vm39_vm3, -1.0, %v123_v7 }
  0x7e   :  { %v42_v10 = vsel %vm36_vm0, 1.0, %v40_v8  ;;  %v43_v11 = vsel %vm37_vm1, 1.0, %v41_v9 }
  0x7f   :  { %44 = vst [vmem:[#allocation5] sm:$0xff] %v42_v10 }
  0x80   :  { %45 = vst [vmem:[#allocation5 + $0x8] sm:$0xff] %v43_v11 }
  0x81   :  { %56 = dma.vmem_to_hbm [thread:$0]  %s52_s16, 256, %s54_s19, [#allocation4]  }
  0x82   :  { %118 = dma.done.wait [#allocation4], 256  }
  0x83   :  { %119 = vsyncadd [#allocation4], 4294967040 }
  0x84   :  { %61 = vsyncpa [#allocation3], 1 }
  0x85   :  { %62 = vsyncpa [#allocation4], 1 }

</bundles_post_ra>
